<compile_context>
chip_gen: v5e
topology: v5e:2x2
jax: 0.10.0
libtpu: 0.0.40
codegen_flags: <defaults>
</compile_context>

<pallas_src>
import functools
import math

import jax
import jax.numpy as jnp
from jax import lax
from jax.scipy.linalg import block_diag
from jax.experimental import pallas as pl
from jax.experimental.pallas import tpu as pltpu

EPS = 1e-6
NOISE_SCALE = 1e-5
NEG_INF = -1e9

# bf16 MXU operands (f32 accumulation) for the plain linear projections
# (QKV, W_O, phase channelizer) and the post-softmax wts@V matmul.  The
# log-domain matmuls feeding exp/softmax scaled by tau stay f32.
# TODO(synk): flip phi/logK/hull matmuls to bf16 after tolerance validation.
MXU_BF16 = True


def _round_up(x, m):
    return ((x + m - 1) // m) * m


def _pick_tile(dim, preferred, align):
    """Pick a tile that divides `dim` when possible (avoids pad/slice copies)."""
    if dim <= preferred:
        return dim                       # full-extent block is always legal
    for t in range(preferred, align - 1, -align):
        if dim % t == 0:
            return t
    return preferred                      # fall back to padding


def _dot_nt(a, b):
    # a (m, k) contracted against b (n, k)  ->  (m, n)   (i.e. a @ b.T)
    return lax.dot_general(a, b, (((1,), (1,)), ((), ())),
                           preferred_element_type=jnp.float32)


# ---------------------------------------------------------------------------
# tiled accumulator matmul (NN or NT), used for phase-channelizer / QKV / W_O
# ---------------------------------------------------------------------------
def _matmul_kernel(a_ref, b_ref, o_ref, acc_ref, *, transpose_b):
    @pl.when(pl.program_id(2) == 0)
    def _():
        acc_ref[...] = jnp.zeros_like(acc_ref)

    a = a_ref[...]
    b = b_ref[...]
    if MXU_BF16:
        a = a.astype(jnp.bfloat16)
        b = b.astype(jnp.bfloat16)
    if transpose_b:
        acc_ref[...] += _dot_nt(a, b)
    else:
        acc_ref[...] += jnp.dot(a, b, preferred_element_type=jnp.float32)

    @pl.when(pl.program_id(2) == pl.num_programs(2) - 1)
    def _():
        o_ref[...] = acc_ref[...]


def pallas_matmul(a, b, transpose_b=False, tm=256, tn=256, tk=512):
    """a @ b (or a @ b.T if transpose_b). bf16 MXU operands, f32 accumulation."""
    a = a.astype(jnp.float32)
    b = b.astype(jnp.float32)
    M, K = a.shape
    if transpose_b:
        N, Kb = b.shape
    else:
        Kb, N = b.shape
    assert K == Kb

    # TODO(synk): on v5e prefer tk=256 and pl.Buffered(3) on the A/B specs.
    tm = _pick_tile(M, tm, 8)
    tn = _pick_tile(N, tn, 128)
    tk = _pick_tile(K, tk, 128)
    Mp, Np, Kp = _round_up(M, tm), _round_up(N, tn), _round_up(K, tk)
    if (Mp, Kp) != (M, K):
        a = jnp.pad(a, ((0, Mp - M), (0, Kp - K)))
    if transpose_b:
        if (Np, Kp) != (N, K):
            b = jnp.pad(b, ((0, Np - N), (0, Kp - K)))
        b_spec = pl.BlockSpec((tn, tk), lambda i, j, k: (j, k))
    else:
        if (Kp, Np) != (K, N):
            b = jnp.pad(b, ((0, Kp - K), (0, Np - N)))
        b_spec = pl.BlockSpec((tk, tn), lambda i, j, k: (k, j))

    out = pl.pallas_call(
        functools.partial(_matmul_kernel, transpose_b=transpose_b),
        out_shape=jax.ShapeDtypeStruct((Mp, Np), jnp.float32),
        grid=(Mp // tm, Np // tn, Kp // tk),
        in_specs=[pl.BlockSpec((tm, tk), lambda i, j, k: (i, k)), b_spec],
        out_specs=pl.BlockSpec((tm, tn), lambda i, j, k: (i, j)),
        scratch_shapes=[pltpu.VMEM((tm, tn), jnp.float32)],
        compiler_params=pltpu.CompilerParams(
            dimension_semantics=("parallel", "parallel", "arbitrary")),
    )(a, b)
    if (Mp, Np) != (M, N):
        out = out[:M, :N]
    return out


# ---------------------------------------------------------------------------
# LogBatchedHull (kind=0) per-token score kernel — fully fused petals
# ---------------------------------------------------------------------------
def _hull_kernel(x_ref, gw_ref, w0_ref, abd_ref, bz_ref, ob_ref, gb_ref, o_ref,
                 *, petals, dim):
    x = x_ref[...]                                           # (TN, D)

    # gate_layer -> softplus -> log-sigmoid-style gate.  MXU matvec instead of
    # a cross-lane XLU reduce.
    gate_lin = _dot_nt(x, gw_ref[...]) + gb_ref[0]           # (TN, 1)
    gate_pre = jax.nn.softplus(gate_lin)
    log_gate = -jax.nn.softplus(-gate_pre)
    xg = x + log_gate                                        # (TN, D)

    r = jnp.sqrt(jnp.mean(xg * xg, axis=-1, keepdims=True) + EPS)
    tau = jnp.minimum(jnp.exp(0.30343 * r + 0.22159), 20.0)  # (TN, 1)

    # layer 0: all petals in ONE MXU matmul (g0 folded into w0cat at init)
    h0_all = jnp.maximum(jax.nn.softplus(_dot_nt(xg, w0_ref[...])), EPS)  # (TN, P*2D)
    # layer 1: all petals in ONE matmul against the block-diagonal A
    #   A_p = g1 * w1_p.T + z_weight_p ; bz_p = g1 * bias_1_p  (prefolded)
    z_all = jnp.dot(h0_all, abd_ref[...],
                    preferred_element_type=jnp.float32) + bz_ref[...]     # (TN, P*D)
    s_all = (jnp.log(jax.nn.softplus(z_all) + EPS) + ob_ref[...]) * tau   # (TN, P*D)

    # two-pass logsumexp over the P petal slabs (slabs are already live)
    m = s_all[:, :dim]
    for p in range(1, petals):
        m = jnp.maximum(m, s_all[:, p * dim:(p + 1) * dim])
    acc = jnp.zeros_like(m)
    for p in range(petals):
        acc = acc + jnp.exp(s_all[:, p * dim:(p + 1) * dim] - m)
    result = (m + jnp.log(acc)) / tau                        # (TN, D)

    # lane-dense (1, TN) output: mean over features folded into an MXU matvec
    inv_d = jnp.full((1, dim), 1.0 / dim, dtype=jnp.float32)
    o_ref[...] = _dot_nt(inv_d, result)                      # (1, TN)


def hull_score(x_tokens, hp, tile_n=256):
    """x_tokens: (N, D) flattened tokens -> (N,) hull scores (kind=0)."""
    N, D = x_tokens.shape
    P = hp["petals"]
    d1 = 2 * D
    if N < tile_n:
        tile_n = _round_up(N, 8)
    N_pad = _round_up(N, tile_n)
    if N_pad != N:
        x_tokens = jnp.pad(x_tokens, ((0, N_pad - N), (0, 0)))

    out = pl.pallas_call(
        functools.partial(_hull_kernel, petals=P, dim=D),
        out_shape=jax.ShapeDtypeStruct((N_pad // tile_n, tile_n), jnp.float32),
        grid=(N_pad // tile_n,),
        in_specs=[
            pl.BlockSpec((tile_n, D), lambda i: (i, 0)),            # x tile
            pl.BlockSpec((1, D), lambda i: (0, 0)),                 # gate W
            pl.BlockSpec((P * d1, D), lambda i: (0, 0)),            # fused w0
            pl.BlockSpec((P * d1, P * D), lambda i: (0, 0)),        # block-diag A
            pl.BlockSpec((1, P * D), lambda i: (0, 0)),             # fused bias
            pl.BlockSpec((1, P * D), lambda i: (0, 0)),             # output bias
            pl.BlockSpec(memory_space=pltpu.MemorySpace.SMEM),      # gate bias
        ],
        out_specs=pl.BlockSpec((1, tile_n), lambda i: (i, 0)),
        compiler_params=pltpu.CompilerParams(
            dimension_semantics=("parallel",)),
    )(x_tokens, hp["gw"], hp["w0cat"], hp["abd"], hp["bz"], hp["ob"], hp["gb"])
    return out.reshape(-1)[:N]


# ---------------------------------------------------------------------------
# LogConvexMixer attention kernel — grid (B*H, S//TQ), phi_k cached in VMEM,
# positional bias + causal mask computed in-kernel, single-pass softmax.
# ---------------------------------------------------------------------------
def _mixer_kernel(q_ref, k_ref, v_ref, fq_ref, gk_ref, tau_ref,
                  whq_ref, whk_ref, posw_ref, o_ref, phik_ref):
    qi = pl.program_id(1)

    # phi_k depends only on (b, h): compute once per (b, h) at the first query
    # tile and keep it in persistent VMEM scratch.  qi is "arbitrary", so the
    # megacore split can never land on it and break this guard.
    @pl.when(qi == 0)
    def _():
        hk = jnp.minimum(_dot_nt(k_ref[0], whk_ref[...]), 20.0)       # (S, R)
        phik_ref[...] = jax.nn.softplus(hk) + EPS

    q = q_ref[0]                # (TQ, D)  gated q (log-domain)
    v = v_ref[0]                # (S, D)   exp-domain values (>= EPS)
    fq = fq_ref[0]              # (TQ, 1)
    gk_row = gk_ref[0]          # (1, S)
    tau = tau_ref[0]            # (TQ, 1)
    tq = q.shape[0]
    s_len = v.shape[0]

    hq = jnp.minimum(_dot_nt(q, whq_ref[...]), 20.0)                  # (TQ, R)
    phi_q = jax.nn.softplus(hq) + EPS
    # logK[i,j] = logsumexp_r(log phi_q[i,r] + log phi_k[j,r]) = log(phi_q @ phi_k.T)
    logK = jnp.log(_dot_nt(phi_q, phik_ref[...]))                     # (TQ, S)

    # positional bias and causal additive mask computed in-kernel (no (S,S)
    # or (TQ,S) HBM->VMEM DMA).
    # TODO(synk): arbitrary (non-causal) additive masks would need a (TQ,S)
    #             mask BlockSpec restored here.
    w = posw_ref[pl.program_id(0)]
    rows = lax.broadcasted_iota(jnp.int32, (tq, s_len), 0) + qi * tq
    cols = lax.broadcasted_iota(jnp.int32, (tq, s_len), 1)
    bias = -w * jnp.abs(rows - cols).astype(jnp.float32)
    mask = jnp.where(rows >= cols, 0.0, NEG_INF)

    logits = (fq + gk_row + logK + bias + mask) * tau                 # (TQ, S)

    # single-pass softmax: one exp + an EUP-slot reciprocal
    lm = jnp.max(logits, axis=-1, keepdims=True)
    p = jnp.exp(logits - lm)
    denom = jnp.sum(p, axis=-1, keepdims=True)
    wts = p * pl.reciprocal(denom, approx=True)                       # (TQ, S)

    if MXU_BF16:
        out_val = jnp.dot(wts.astype(jnp.bfloat16), v.astype(jnp.bfloat16),
                          preferred_element_type=jnp.float32)
    else:
        out_val = jnp.dot(wts, v, preferred_element_type=jnp.float32)
    o_ref[0] = jnp.log(jnp.maximum(out_val + EPS, EPS))


def mixer_attend(q, k, v_exp, fq, gk, tau, pos_w_bh, whq, whk):
    BH, S, D = q.shape
    R = whq.shape[0]
    TQ = S if S <= 128 else 128
    assert S % TQ == 0, "sequence length must be a multiple of the query tile"

    def bh_full(shape):
        return pl.BlockSpec(shape, lambda n, qi: (n,) + (0,) * (len(shape) - 1))

    # TODO(synk): for long S on v7x (64 MiB VMEM) add a third "arbitrary" KV
    #             grid axis with flash-style online-softmax accumulators
    #             instead of full-S K/V blocks, and raise vmem_limit_bytes.
    # TODO(synk): for D < 128 the (1, TQ, D) output stores are not lane-dense;
    #             folding several heads per block would recover full stores.
    return pl.pallas_call(
        _mixer_kernel,
        out_shape=jax.ShapeDtypeStruct((BH, S, D), jnp.float32),
        grid=(BH, S // TQ),
        in_specs=[
            pl.BlockSpec((1, TQ, D), lambda n, qi: (n, qi, 0)),   # q (gated)
            bh_full((1, S, D)),                                   # k
            bh_full((1, S, D)),                                   # v (exp-domain)
            pl.BlockSpec((1, TQ, 1), lambda n, qi: (n, qi, 0)),   # fq
            bh_full((1, 1, S)),                                   # gk (row layout)
            pl.BlockSpec((1, TQ, 1), lambda n, qi: (n, qi, 0)),   # tau
            pl.BlockSpec((R, D), lambda n, qi: (0, 0)),           # lin_h_q weight
            pl.BlockSpec((R, D), lambda n, qi: (0, 0)),           # lin_h_k weight
            pl.BlockSpec(memory_space=pltpu.MemorySpace.SMEM),    # pos_w per (b,h)
        ],
        out_specs=pl.BlockSpec((1, TQ, D), lambda n, qi: (n, qi, 0)),
        scratch_shapes=[pltpu.VMEM((S, R), jnp.float32)],         # phi_k cache
        compiler_params=pltpu.CompilerParams(
            # BH is the only parallel axis: required for the phi_k hoist and
            # keeps a v7x megacore split on disjoint (b,h) K/V.
            dimension_semantics=("parallel", "arbitrary")),
    )(q, k, v_exp, fq, gk, tau, whq, whk, pos_w_bh)


# ---------------------------------------------------------------------------
# Plain-JAX glue (parameter prep, reshapes, small deterministic pieces)
# ---------------------------------------------------------------------------
def phase_channelizer(x, mask_exp, gate_raw):
    """InterleavedPhaseChannelizer.forward; x is (B, T, 2M)."""
    B, T, D2 = x.shape
    M = D2 // 2
    x_c = x[..., 0::2]                                        # (B, T, M)
    pos = jnp.arange(T, dtype=x.dtype)
    dist = jnp.abs(pos[None, :] - pos[:, None])
    W = 1.0 / (dist + 1.0)
    W = W * mask_exp
    W = W / jnp.maximum(jnp.sum(W, axis=-1, keepdims=True), 1e-6)
    W = W * mask_exp
    W = W / jnp.maximum(jnp.sum(W, axis=-1, keepdims=True), 1e-6)
    # phi[b,i,m] = sum_j W[i,j] x_c[b,j,m]   (as a single (T,T)@(T,B*M) matmul)
    xc_t = jnp.transpose(x_c, (1, 0, 2)).reshape(T, B * M)
    phi = jnp.transpose(pallas_matmul(W, xc_t).reshape(T, B, M), (1, 0, 2))
    gate = jax.nn.softplus(gate_raw)[None, None, :]
    return x.at[..., 1::2].set(gate * phi)


def log_convex_mixer(q, k, v_exp, pos_w, params, noise_key):
    B, H, S, D = q.shape
    BH = B * H

    gate_q = jax.nn.softplus(q)
    q = q * gate_q
    r_ = jnp.sqrt(jnp.mean(q * q, axis=-1, keepdims=True) + EPS)
    tau = jnp.minimum(jnp.exp(0.30343 * r_ + 0.22159), 20.0)   # (B,H,S,1)

    # "creative" perturbation (forward-mode identical to the reference apart
    # from the RNG stream); base + perturbed tokens are batched into ONE
    # hull_score call per hull.
    kq, kk = jax.random.split(noise_key)
    qn = (jax.random.uniform(kq, q.shape, q.dtype) - 0.5) * NOISE_SCALE
    kn = (jax.random.uniform(kk, k.shape, k.dtype) - 0.5) * NOISE_SCALE

    NQ = BH * S
    q_tok = jnp.concatenate([q.reshape(NQ, D), (q + qn).reshape(NQ, D)], axis=0)
    k_tok = jnp.concatenate([k.reshape(NQ, D), (k + kn).reshape(NQ, D)], axis=0)
    sq = hull_score(q_tok, params["hull_q"])
    sk = hull_score(k_tok, params["hull_k"])
    fq = sq[:NQ] - 0.1 * (sq[NQ:] - sq[:NQ])
    gk = sk[:NQ] - 0.1 * (sk[NQ:] - sk[:NQ])

    pos_w_bh = jnp.broadcast_to(pos_w[None, :], (B, H)).reshape(BH)

    out = mixer_attend(
        q.reshape(BH, S, D), k.reshape(BH, S, D), v_exp.reshape(BH, S, D),
        fq.reshape(BH, S, 1), gk.reshape(BH, 1, S), tau.reshape(BH, S, 1),
        pos_w_bh, params["w_hq"], params["w_hk"])
    return out.reshape(B, H, S, D)


def forward(x_log, mask_exp, params, noise_key):
    """mask_exp is the (S,S) causal tril; the additive causal mask is built
    in-kernel inside the mixer."""
    B, S, E = x_log.shape
    H = params["pos_w_raw"].shape[0]
    D = E // H

    x = jnp.exp(x_log)
    x = phase_channelizer(x, mask_exp, params["phase_gate_raw"])

    # LinearPreMix (use=1); NT contraction avoids materializing w_qkv.T
    qkv = pallas_matmul(x.reshape(B * S, E), params["w_qkv"],
                        transpose_b=True).reshape(B, S, 3 * E)
    q_val, k_val, v_val = jnp.split(qkv, 3, axis=-1)

    def heads(t):
        return t.reshape(B, S, H, D).transpose(0, 2, 1, 3)

    Q_val, K_val, V_val = heads(q_val), heads(k_val), heads(v_val)

    mean = 0.5 * (Q_val.mean() + K_val.mean())
    std = 0.5 * (jnp.std(Q_val, ddof=1) + jnp.std(K_val, ddof=1))
    Q_val = (Q_val - mean) / std
    K_val = (K_val - mean) / std
    Q_log = jnp.log(jnp.maximum(Q_val, EPS))
    K_log = jnp.log(jnp.maximum(K_val, EPS))
    # exp(log(max(V,eps))) == max(V,eps): skip the log/exp roundtrip entirely.
    V_exp = jnp.maximum(V_val, EPS)

    pos_w = jax.nn.softplus(params["pos_w_raw"])              # (H,)

    y_log = log_convex_mixer(Q_log, K_log, V_exp, pos_w, params, noise_key)
    y = y_log.transpose(0, 2, 1, 3).reshape(B, S, E)
    return pallas_matmul(y.reshape(B * S, E), params["w_o"],
                         transpose_b=True).reshape(B, S, E)


# ---------------------------------------------------------------------------
# deterministic parameter initialization (matching the module's shapes);
# hull parameters are pre-folded (g0 into w0, g1/z_weight into one block-
# diagonal matrix, biases flattened petal-major).
# ---------------------------------------------------------------------------
def init_params(key, E, H, D, P, R):
    d1 = 2 * D
    ks = jax.random.split(key, 8)

    def hull_params(k):
        k1, k2, k3, k4, k5 = jax.random.split(k, 5)
        wr0 = math.log(math.sqrt(2.0 / D)) + 0.2 * jax.random.normal(
            k1, (P, d1, D), jnp.float32)
        wr1 = math.log(math.sqrt(2.0 / d1)) + 0.2 * jax.random.normal(
            k2, (P, D, d1), jnp.float32)
        zb = 1.0 / math.sqrt(d1)
        zw = jax.random.uniform(k3, (P, d1, D), jnp.float32, -zb, zb)
        b1 = jnp.zeros((P, D), jnp.float32)
        ob = jnp.zeros((P, D), jnp.float32)
        gw = jax.random.uniform(k4, (1, D), jnp.float32,
                                -1.0 / math.sqrt(D), 1.0 / math.sqrt(D))
        gb = jax.random.uniform(k5, (1,), jnp.float32,
                                -1.0 / math.sqrt(D), 1.0 / math.sqrt(D))
        g0 = jax.nn.sigmoid(jnp.full((P,), -3.0, jnp.float32))
        g1 = jax.nn.sigmoid(jnp.full((P,), -3.0, jnp.float32))
        w0 = jnp.square(jax.nn.softplus(wr0))                  # (P, d1, D)
        w1 = jnp.square(jax.nn.softplus(wr1))                  # (P, D, d1)
        # fold the per-petal scalars once at init:
        #   (x @ w0_p.T) * g0_p == x @ (g0_p * w0_p).T
        #   x1*g1 + res         == h0 @ (g1*w1_p.T + zw_p) + g1*b1_p
        w0cat = (w0 * g0[:, None, None]).reshape(P * d1, D)
        a = g1[:, None, None] * jnp.transpose(w1, (0, 2, 1)) + zw   # (P, d1, D)
        abd = block_diag(*[a[p] for p in range(P)])                 # (P*d1, P*D)
        bz = (g1[:, None] * b1).reshape(1, P * D)
        ob_flat = ob.reshape(1, P * D)
        return dict(gw=gw, gb=gb, w0cat=w0cat, abd=abd, bz=bz, ob=ob_flat,
                    petals=P)

    lb = 1.0 / math.sqrt(E)
    db = 1.0 / math.sqrt(D)
    return dict(
        phase_gate_raw=jnp.full((E // 2,), -3.0, jnp.float32),
        w_qkv=jax.random.uniform(ks[0], (3 * E, E), jnp.float32, -lb, lb),
        w_o=jax.random.uniform(ks[1], (E, E), jnp.float32, -lb, lb),
        w_hq=jax.random.uniform(ks[2], (R, D), jnp.float32, -db, db),
        w_hk=jax.random.uniform(ks[3], (R, D), jnp.float32, -db, db),
        pos_w_raw=jnp.zeros((H,), jnp.float32),
        hull_q=hull_params(ks[4]),
        hull_k=hull_params(ks[5]),
    )


# ---------------------------------------------------------------------------
if __name__ == "__main__":
    B, S, E, H, P = 2, 8, 16, 2, 4          # embed_dim=16, heads=2, petals=4
    D = E // H
    R = 2 * D

    key = jax.random.PRNGKey(0)
    k_x, k_p, k_noise = jax.random.split(key, 3)

    x_log = jax.random.normal(k_x, (B, S, E), jnp.float32)
    causal = jnp.tril(jnp.ones((S, S), jnp.float32))   # mask_exp (causal tril)

    params = init_params(k_p, E, H, D, P, R)

    y = forward(x_log, causal, params, k_noise)
    y = jax.block_until_ready(y)

    assert y.shape == (B, S, E), y.shape
    assert bool(jnp.all(jnp.isfinite(y)))
    print("KERNEL_OK")
</pallas_src>

<mosaic_0001>
module attributes {stable_mosaic.version = 11 : i64} {
  func.func @_matmul_kernel(%arg0: i32, %arg1: i32, %arg2: i32, %arg3: memref<8x8xf32, #tpu.memory_space<vmem>>, %arg4: memref<8x16xf32, #tpu.memory_space<vmem>>, %arg5: memref<8x16xf32, #tpu.memory_space<vmem>>, %arg6: memref<8x16xf32, #tpu.memory_space<vmem>>) attributes {dimension_semantics = [#tpu.dimension_semantics<parallel>, #tpu.dimension_semantics<parallel>, #tpu.dimension_semantics<arbitrary>], iteration_bounds = array<i64: 1, 1, 1>, scalar_prefetch = 0 : i64, scratch_operands = 1 : i64, tpu.core_type = #tpu.core_type<tc>, window_params = [{transform_indices = @transform_0, window_bounds = array<i64: 8, 8>}, {transform_indices = @transform_1, window_bounds = array<i64: 8, 16>}, {transform_indices = @transform_2, window_bounds = array<i64: 8, 16>}]} {
    %c0_i32 = arith.constant 0 : i32
    %0 = arith.cmpi eq, %arg2, %c0_i32 : i32
    %1 = arith.extui %0 : i1 to i32
    %c0_i32_0 = arith.constant 0 : i32
    %2 = arith.cmpi ne, %1, %c0_i32_0 : i32
    scf.if %2 {
      %cst_10 = arith.constant 0.000000e+00 : f32
      %14 = vector.broadcast %cst_10 : f32 to vector<8x16xf32>
      %c0_11 = arith.constant 0 : index
      %c0_12 = arith.constant 0 : index
      %15 = vector.load %arg6[%c0_11, %c0_12] : memref<8x16xf32, #tpu.memory_space<vmem>>, vector<8x16xf32>
      tpu.vector_store %arg6[%c0_11, %c0_12], %14 {strides = array<i32>} : memref<8x16xf32, #tpu.memory_space<vmem>>, vector<8x16xf32>,
    } else {
    }
    %c0 = arith.constant 0 : index
    %c0_1 = arith.constant 0 : index
    %3 = vector.load %arg3[%c0, %c0_1] : memref<8x8xf32, #tpu.memory_space<vmem>>, vector<8x8xf32>
    %c0_2 = arith.constant 0 : index
    %c0_3 = arith.constant 0 : index
    %4 = vector.load %arg4[%c0_2, %c0_3] : memref<8x16xf32, #tpu.memory_space<vmem>>, vector<8x16xf32>
    %5 = arith.truncf %3 : vector<8x8xf32> to vector<8x8xbf16>
    %6 = arith.truncf %4 : vector<8x16xf32> to vector<8x16xbf16>
    %c0_4 = arith.constant 0 : index
    %c0_5 = arith.constant 0 : index
    %7 = vector.load %arg6[%c0_4, %c0_5] : memref<8x16xf32, #tpu.memory_space<vmem>>, vector<8x16xf32>
    %cst = arith.constant dense<0.000000e+00> : vector<8x16xf32>
    %8 = tpu.matmul %5, %6, %cst {dimension_numbers = #tpu.dot_dimension_numbers<[1], [0], [0], [1], [0, 0, 1, 1], [], []>} : vector<8x8xbf16>, vector<8x16xbf16>, vector<8x16xf32> -> vector<8x16xf32>
    %9 = arith.addf %7, %8 : vector<8x16xf32>
    %c0_6 = arith.constant 0 : index
    %c0_7 = arith.constant 0 : index
    %10 = vector.load %arg6[%c0_6, %c0_7] : memref<8x16xf32, #tpu.memory_space<vmem>>, vector<8x16xf32>
    tpu.vector_store %arg6[%c0_6, %c0_7], %9 {strides = array<i32>} : memref<8x16xf32, #tpu.memory_space<vmem>>, vector<8x16xf32>,
    %c0_i32_8 = arith.constant 0 : i32
    %11 = arith.cmpi eq, %arg2, %c0_i32_8 : i32
    %12 = arith.extui %11 : i1 to i32
    %c0_i32_9 = arith.constant 0 : i32
    %13 = arith.cmpi ne, %12, %c0_i32_9 : i32
    scf.if %13 {
      %c0_10 = arith.constant 0 : index
      %c0_11 = arith.constant 0 : index
      %14 = vector.load %arg6[%c0_10, %c0_11] : memref<8x16xf32, #tpu.memory_space<vmem>>, vector<8x16xf32>
      %c0_12 = arith.constant 0 : index
      %c0_13 = arith.constant 0 : index
      %15 = vector.load %arg5[%c0_12, %c0_13] : memref<8x16xf32, #tpu.memory_space<vmem>>, vector<8x16xf32>
      tpu.vector_store %arg5[%c0_12, %c0_13], %14 {strides = array<i32>} : memref<8x16xf32, #tpu.memory_space<vmem>>, vector<8x16xf32>,
    } else {
    }
    return
  }
  func.func @transform_0(%arg0: i32, %arg1: i32, %arg2: i32) -> (i32, i32) {
    %c0_i32 = arith.constant 0 : i32
    return %arg0, %arg2 : i32, i32
  }
  func.func @transform_1(%arg0: i32, %arg1: i32, %arg2: i32) -> (i32, i32) {
    %c0_i32 = arith.constant 0 : i32
    return %arg2, %arg1 : i32, i32
  }
  func.func @transform_2(%arg0: i32, %arg1: i32, %arg2: i32) -> (i32, i32) {
    %c0_i32 = arith.constant 0 : i32
    return %arg0, %arg1 : i32, i32
  }
}

</mosaic_0001>

<bundles_post_ra>
// kernel: tpu_custom_call.1
= control target key start
LH: loop header
LB: loop body
LE: loop exit
PB: predicated region body
PF: predicated region fallthrough
CT: control target
= control target key end

     0   :  { %7 = vsyncpa [#allocation4], 0  ;;  %s213_s0 = inlined_call_operand.hbm [shape: f32[8,8], index: 0, kind: input, shape index: {}]   ;;  %s214_s1 = inlined_call_operand.hbm [shape: f32[8,16], index: 1, kind: input, shape index: {}]   ;;  %s215_s2 = inlined_call_operand.hbm [shape: f32[8,16], index: 2, kind: output, shape index: {}]  }
   0x1   :  { %8 = vsyncpa [#allocation7], 0 }
   0x2   :  { %9 = vsyncpa [#allocation5], 0  ;;  %s15_s11 = sshll.u32 %s213_s0, 4  ;;  %s182_s12 = smov [#allocation3]   ;;  %s16_s11 = int_to_ptr.hbm [resolvable:$true] %s15_s11 }
   0x3   :  { %s17_s13 = sshll.u32 %s182_s12, 4  ;;  %s26_s16 = sshll.u32 %s214_s1, 4  ;;  %s18_s13 = int_to_ptr.vmem [resolvable:$true] %s17_s13  ;;  %s27_s16 = int_to_ptr.hbm [resolvable:$true] %s26_s16 }
   0x4   :  { %20 = dma.hbm_to_vmem [thread:$0]  %s16_s11, 128, %s18_s13, [#allocation4]  }
   0x5   :  { %s183_s17 = smov [#allocation6]  }
   0x6   :  { %s28_s18 = sshll.u32 %s183_s17, 4  ;;  %s29_s18 = int_to_ptr.vmem [resolvable:$true] %s28_s18 }
   0x7   :  { %31 = dma.hbm_to_vmem [thread:$0]  %s27_s16, 128, %s29_s18, [#allocation7]  }
   0x8   :  { %176 = dma.done.wait [#allocation4], 128  }
   0x9   :  { %177 = vsyncadd [#allocation4], 4294967168 }
   0xa   :  { %178 = dma.done.wait [#allocation7], 128  }
   0xb   :  { %179 = vsyncadd [#allocation7], 4294967168  ;;  %vm45_vm0 = vcmask 130048   ;;  %v184_v0 = vmov 0.0   ;;  %v48_v1 = vld [vmem:[#allocation6] sm:$0xff]  ;;  %vm56_vm1 = vcmask 1043456  }
   0xc   :  { %46 = vst.msk [vmem:[#allocation2] sm:$0xff] %vm45_vm0, %v184_v0  ;;  %v47_v2 = vld [vmem:[#allocation3] sm:$0xff]  ;;  %v50_v3 = vpack.c.bf16 %v48_v1, %v48_v1  ;;  %vm52_vm2 = vcmask 64512   ;;  %s185_s0 = smov [#allocation8]   ;;  %s88_s21 = sshll.u32 %s215_s2, 4  ;;  %s89_s21 = int_to_ptr.hbm [resolvable:$true] %s88_s21 }
   0xd   :  { %v49_v5 = vpack.c.bf16 %v47_v2, %v47_v2  ;;  %s86_s1 = sshll.u32 %s185_s0, 4  ;;  %s87_s1 = int_to_ptr.vmem [resolvable:$true] %s86_s1 }
   0xe   :  { %v58_v4 = vsel %vm56_vm1, %v50_v3, 0 }
   0xf   :  { %67 = vmatpush.bf16.msra.mxu0 %v58_v4 }
  0x12   :  { %99 = vmatmul.msk.bf16.vlgmr.msra.gmra.mxu0 %vm52_vm2, %v49_v5 }
  0x13   :  { %v51_v6 = vld [vmem:[#allocation2] sm:$0xff] }
  0x8f   :  { %v69_v7 = vpop.f32.mrf.mxu0 }
  0x90   :  { %v73_v8 = vadd.f32 %v69_v7, %v51_v6 }
  0x92   :  { %75 = vst.msk [vmem:[#allocation2] sm:$0xff] %vm45_vm0, %v73_v8 }
  0x97   :  { %v71_v9 = vpop.f32.mrf.mxu0 }
  0x99   :  { %v79_v10 = vld [vmem:[#allocation2] sm:$0xff] }
  0x9a   :  { %80 = vst.msk [vmem:[#allocation8] sm:$0xff] %vm45_vm0, %v79_v10 }
  0x9b   :  { %91 = dma.vmem_to_hbm [thread:$0]  %s87_s1, 128, %s89_s21, [#allocation5]  }
  0x9c   :  { %180 = dma.done.wait [#allocation5], 128  }
  0x9d   :  { %181 = vsyncadd [#allocation5], 4294967168 }
  0x9e   :  { %96 = vsyncpa [#allocation4], 1 }
  0x9f   :  { %97 = vsyncpa [#allocation7], 1 }
  0xa0   :  { %98 = vsyncpa [#allocation5], 1 }

</bundles_post_ra>
